<compile_context>
chip_gen: v5e
topology: v5e:2x2
jax: 0.10.0
libtpu: 0.0.40
codegen_flags: <defaults>
</compile_context>

<pallas_src>
import functools

import jax
import jax.numpy as jnp
from jax.experimental import pallas as pl
from jax.experimental.pallas import tpu as pltpu

HIDDEN1 = 128
HIDDEN2 = 64

VMEM_LIMIT = 48 * 1024 * 1024  # fits v7x's 64 MiB physical VMEM with margin


def _round_up(x, m):
    return (x + m - 1) // m * m


def _largest_tile(n_pad, cap):
    """Largest multiple of 128 that divides n_pad and is <= cap (>= 128)."""
    q = n_pad // 128
    cap_m = max(1, cap // 128)
    best = 1
    for m in range(1, min(q, cap_m) + 1):
        if q % m == 0:
            best = m
    return best * 128


def _pick_tiles(n_pad):
    # Row tile tm: big enough to amortize the ~0.35us/step overhead, but
    # capped at n_pad//2 so the 'parallel' i axis keeps >=2 tiles (megacore).
    tm_cap = max(128, min(1024, (n_pad // 2 // 128) * 128))
    tm = _largest_tile(n_pad, tm_cap)
    tk = _largest_tile(n_pad, 2048)      # reduction tile: as large as possible
    return tm, tk


# --------------------------------------------------------------------------- #
# Kernels
# --------------------------------------------------------------------------- #
def gcn_layer1_kernel(a_ref, xw1_ref, dinv_ref, b1_ref, w2_ref, hw2_ref,
                      acc_ref, *, tk):
    """acc[i]  = sum_k A01[i,k] @ (d^-1/2 . XW1)[k]     (int8 A, f32 accum)
       HW2[i]  = d_i^-1/2 * (relu(d_i^-1/2 * acc[i] + b1) @ W2)
       The trailing d_i^-1/2 is layer 2's column prescale; it also zeroes
       padded rows (their degree is 0), so no bias garbage ever leaks."""
    k = pl.program_id(1)

    @pl.when(k == 0)
    def _():
        acc_ref[...] = jnp.zeros_like(acc_ref)

    # int8 -> bf16 cast (exact for small edge counts); VPU work hidden under
    # the A-tile DMA.  Two-step via f32 keeps the convert on well-trodden paths.
    a_tile = a_ref[...].astype(jnp.float32).astype(jnp.bfloat16)
    start = pl.multiple_of(k * tk, tk)
    feat = xw1_ref[pl.ds(start, tk), :]                 # VMEM-resident XW1
    acc_ref[...] += jnp.dot(a_tile, feat, preferred_element_type=jnp.float32)

    @pl.when(k == pl.num_programs(1) - 1)
    def _():
        d_i = dinv_ref[...]                                       # (tm, 1) f32
        h1 = jnp.maximum(acc_ref[...] * d_i + b1_ref[...], 0.0)
        hw2 = jnp.dot(h1.astype(jnp.bfloat16), w2_ref[...],
                      preferred_element_type=jnp.float32)
        hw2_ref[...] = (hw2 * d_i).astype(hw2_ref.dtype)


def gcn_layer2_kernel(a_ref, hw2_ref, dinv_ref, b2_ref, psum_ref, acc_ref, *,
                      tk, tm, n_valid):
    """Layer-2 aggregation fused with masked mean-pool partial sums."""
    i = pl.program_id(0)
    k = pl.program_id(1)

    @pl.when(k == 0)
    def _():
        acc_ref[...] = jnp.zeros_like(acc_ref)

    a_tile = a_ref[...].astype(jnp.float32).astype(jnp.bfloat16)
    start = pl.multiple_of(k * tk, tk)
    feat = hw2_ref[pl.ds(start, tk), :]          # resident, already d-prescaled
    acc_ref[...] += jnp.dot(a_tile, feat, preferred_element_type=jnp.float32)

    @pl.when(k == pl.num_programs(1) - 1)
    def _():
        # Finalize in place: H2 = relu(d_i^-1/2 * acc + b2).
        acc_ref[...] = jnp.maximum(acc_ref[...] * dinv_ref[...] + b2_ref[...],
                                   0.0)

        # Only the last row tile can contain padded rows -> mask only there.
        @pl.when(i == pl.num_programs(0) - 1)
        def _():
            row_id = i * tm + jax.lax.broadcasted_iota(jnp.int32,
                                                       acc_ref.shape, 0)
            acc_ref[...] = jnp.where(row_id < n_valid, acc_ref[...], 0.0)

        part = jnp.sum(acc_ref[...], axis=0, keepdims=True)      # (1, HIDDEN2)
        row0 = jax.lax.broadcasted_iota(jnp.int32, psum_ref.shape, 0) == 0
        psum_ref[...] = jnp.where(row0, part, 0.0)               # full store


# --------------------------------------------------------------------------- #
# XLA glue
# --------------------------------------------------------------------------- #
def build_graph_operands(edge_index, n, n_pad):
    """Padded int8 adjacency (A[dst,src] += 1, self loops) and d^-1/2 vector."""
    src, dst = edge_index[0], edge_index[1]
    loops = jnp.arange(n, dtype=edge_index.dtype)
    src = jnp.concatenate([src, loops])
    dst = jnp.concatenate([dst, loops])
    # Single scatter straight into the final padded int8 layout.
    a = jnp.zeros((n_pad, n_pad), jnp.int8).at[dst, src].add(jnp.int8(1))
    # Degree from the edge list (O(E)); equals the row-sum of A + I.
    deg = jnp.zeros((n_pad,), jnp.float32).at[dst].add(1.0)
    d_inv_sqrt = jnp.where(deg > 0.0, jax.lax.rsqrt(deg), 0.0)
    return a, d_inv_sqrt[:, None]                  # (n_pad, n_pad), (n_pad, 1)


def gnn_forward(x, edge_index, params):
    n = x.shape[0]
    n_pad = _round_up(n, 128)
    tm, tk = _pick_tiles(n_pad)
    gi, gk = n_pad // tm, n_pad // tk

    a_p, d_inv = build_graph_operands(edge_index, n, n_pad)

    # X @ W1 in XLA (K=3 uses ~2% of MXU depth); fold in the column prescale.
    x_p = jnp.pad(x, ((0, n_pad - n), (0, 0)))
    xw1 = jnp.dot(x_p, params["w1"], preferred_element_type=jnp.float32)
    xw1_s = (xw1 * d_inv).astype(jnp.bfloat16)       # padded rows are exactly 0
    w2_b = params["w2"].astype(jnp.bfloat16)

    compiler_params = pltpu.CompilerParams(
        dimension_semantics=("parallel", "arbitrary"),
        vmem_limit_bytes=VMEM_LIMIT)

    # ---- Layer 1: HW2 = d^-1/2 . (relu(d^-1/2 . (A @ (d^-1/2 . XW1)) + b1) @ W2)
    kernel1 = functools.partial(gcn_layer1_kernel, tk=tk)
    hw2 = pl.pallas_call(
        kernel1,
        out_shape=jax.ShapeDtypeStruct((n_pad, HIDDEN2), jnp.bfloat16),
        grid_spec=pltpu.PrefetchScalarGridSpec(
            num_scalar_prefetch=0,
            grid=(gi, gk),
            in_specs=[
                pl.BlockSpec((tm, tk), lambda i, k: (i, k)),           # A int8
                pl.BlockSpec((n_pad, HIDDEN1), lambda i, k: (0, 0)),   # XW1 res
                pl.BlockSpec((tm, 1), lambda i, k: (i, 0)),            # d^-1/2
                pl.BlockSpec((1, HIDDEN1), lambda i, k: (0, 0)),       # b1
                pl.BlockSpec((HIDDEN1, HIDDEN2), lambda i, k: (0, 0)),  # W2
            ],
            out_specs=pl.BlockSpec((tm, HIDDEN2), lambda i, k: (i, 0)),
            scratch_shapes=[pltpu.VMEM((tm, HIDDEN1), jnp.float32)]),
        compiler_params=compiler_params,
    )(a_p, xw1_s, d_inv, params["b1"], w2_b)

    # ---- Layer 2 + fused masked mean-pool partials ---------------------------
    kernel2 = functools.partial(gcn_layer2_kernel, tk=tk, tm=tm, n_valid=n)
    psum = pl.pallas_call(
        kernel2,
        out_shape=jax.ShapeDtypeStruct((gi * 8, HIDDEN2), jnp.float32),
        grid_spec=pltpu.PrefetchScalarGridSpec(
            num_scalar_prefetch=0,
            grid=(gi, gk),
            in_specs=[
                pl.BlockSpec((tm, tk), lambda i, k: (i, k)),           # A int8
                pl.BlockSpec((n_pad, HIDDEN2), lambda i, k: (0, 0)),   # HW2 res
                pl.BlockSpec((tm, 1), lambda i, k: (i, 0)),            # d^-1/2
                pl.BlockSpec((1, HIDDEN2), lambda i, k: (0, 0)),       # b2
            ],
            out_specs=pl.BlockSpec((8, HIDDEN2), lambda i, k: (i, 0)),
            scratch_shapes=[pltpu.VMEM((tm, HIDDEN2), jnp.float32)]),
        compiler_params=compiler_params,
    )(a_p, hw2, d_inv, params["b2"])

    # mean over nodes + final Linear(64 -> 3): tiny, stays in XLA.
    pooled = jnp.sum(psum, axis=0) * (1.0 / n)                        # (64,)
    out = jnp.dot(pooled, params["w_fc"],
                  preferred_element_type=jnp.float32) + params["b_fc"]
    return out                                                         # (3,)


# --------------------------------------------------------------------------- #
# Reference + test harness
# --------------------------------------------------------------------------- #
def _reference_normalized_adjacency(edge_index, num_nodes):
    src, dst = edge_index[0], edge_index[1]
    loops = jnp.arange(num_nodes, dtype=edge_index.dtype)
    src = jnp.concatenate([src, loops])
    dst = jnp.concatenate([dst, loops])
    a = jnp.zeros((num_nodes, num_nodes), jnp.float32)
    a = a.at[dst, src].add(1.0)
    deg = jnp.sum(a, axis=1)
    d_inv_sqrt = jnp.where(deg > 0.0, jax.lax.rsqrt(deg), 0.0)
    return d_inv_sqrt[:, None] * a * d_inv_sqrt[None, :]


def gnn_reference(x, edge_index, params):
    """Pure-JAX f32 reference for a tolerance check."""
    a_hat = _reference_normalized_adjacency(edge_index, x.shape[0])
    h1 = jax.nn.relu(a_hat @ (x @ params["w1"]) + params["b1"])
    h2 = jax.nn.relu(a_hat @ (h1 @ params["w2"]) + params["b2"])
    pooled = jnp.mean(h2, axis=0)
    return pooled @ params["w_fc"] + params["b_fc"]


def init_params(key):
    """Deterministic synthetic weights (glorot-ish for GCN, zeros for bias)."""
    k1, k2, k3, k4 = jax.random.split(key, 4)

    def glorot(k, shape):
        lim = (6.0 / (shape[0] + shape[1])) ** 0.5
        return jax.random.uniform(k, shape, jnp.float32, -lim, lim)

    return {
        "w1": glorot(k1, (3, HIDDEN1)),
        "b1": jnp.zeros((1, HIDDEN1), jnp.float32),
        "w2": glorot(k2, (HIDDEN1, HIDDEN2)),
        "b2": jnp.zeros((1, HIDDEN2), jnp.float32),
        "w_fc": glorot(k3, (HIDDEN2, 3)),
        "b_fc": jax.random.uniform(k4, (3,), jnp.float32, -0.1, 0.1),
    }


if __name__ == "__main__":
    key = jax.random.PRNGKey(0)
    kx, ke, kp = jax.random.split(key, 3)

    num_nodes = 16
    num_edges = 32
    # node features: [N, 3]  (data.x)
    x = jax.random.normal(kx, (num_nodes, 3), jnp.float32)
    # edge_index: [2, E] int32  (data.edge_index)
    edge_index = jax.random.randint(ke, (2, num_edges), 0, num_nodes,
                                    dtype=jnp.int32)
    params = init_params(kp)

    out = jax.jit(gnn_forward)(x, edge_index, params)
    out = jax.block_until_ready(out)
    assert out.shape == (3,)

    ref = gnn_reference(x, edge_index, params)
    assert jnp.allclose(out, ref, rtol=5e-2, atol=5e-2), (out, ref)
    print("KERNEL_OK")
</pallas_src>

<mosaic_0001>
module attributes {stable_mosaic.version = 11 : i64} {
  func.func @gcn_layer1_kernel(%arg0: i32, %arg1: i32, %arg2: memref<128x128xi8, #tpu.memory_space<vmem>>, %arg3: memref<128x128xbf16, #tpu.memory_space<vmem>>, %arg4: memref<128x1xf32, #tpu.memory_space<vmem>>, %arg5: memref<1x128xf32, #tpu.memory_space<vmem>>, %arg6: memref<128x64xbf16, #tpu.memory_space<vmem>>, %arg7: memref<128x64xbf16, #tpu.memory_space<vmem>>, %arg8: memref<128x128xf32, #tpu.memory_space<vmem>>) attributes {dimension_semantics = [#tpu.dimension_semantics<parallel>, #tpu.dimension_semantics<arbitrary>], iteration_bounds = array<i64: 1, 1>, scalar_prefetch = 0 : i64, scratch_operands = 1 : i64, tpu.core_type = #tpu.core_type<tc>, window_params = [{transform_indices = @transform_0, window_bounds = array<i64: 128, 128>}, {pipeline_mode = #tpu.pipeline_mode<synchronous>, transform_indices = @transform_1, window_bounds = array<i64: 128, 128>}, {transform_indices = @transform_2, window_bounds = array<i64: 128, 1>}, {pipeline_mode = #tpu.pipeline_mode<synchronous>, transform_indices = @transform_3, window_bounds = array<i64: 1, 128>}, {pipeline_mode = #tpu.pipeline_mode<synchronous>, transform_indices = @transform_4, window_bounds = array<i64: 128, 64>}, {transform_indices = @transform_5, window_bounds = array<i64: 128, 64>}]} {
    %c0_i32 = arith.constant 0 : i32
    %0 = arith.cmpi eq, %arg1, %c0_i32 : i32
    %1 = arith.extui %0 : i1 to i32
    %c0_i32_0 = arith.constant 0 : i32
    %2 = arith.cmpi ne, %1, %c0_i32_0 : i32
    scf.if %2 {
      %cst_9 = arith.constant 0.000000e+00 : f32
      %17 = vector.broadcast %cst_9 : f32 to vector<128x128xf32>
      %c0_10 = arith.constant 0 : index
      %c0_11 = arith.constant 0 : index
      %18 = vector.load %arg8[%c0_10, %c0_11] : memref<128x128xf32, #tpu.memory_space<vmem>>, vector<128x128xf32>
      tpu.vector_store %arg8[%c0_10, %c0_11], %17 {strides = array<i32>} : memref<128x128xf32, #tpu.memory_space<vmem>>, vector<128x128xf32>,
    } else {
    }
    %c0 = arith.constant 0 : index
    %c0_1 = arith.constant 0 : index
    %3 = vector.load %arg2[%c0, %c0_1] : memref<128x128xi8, #tpu.memory_space<vmem>>, vector<128x128xi8>
    %4 = arith.sitofp %3 : vector<128x128xi8> to vector<128x128xf32>
    %5 = arith.truncf %4 : vector<128x128xf32> to vector<128x128xbf16>
    %c128_i32 = arith.constant 128 : i32
    %6 = arith.muli %arg1, %c128_i32 : i32
    %7 = tpu.assume_multiple %6, 128 : i32
    %8 = arith.index_cast %7 : i32 to index
    %c0_2 = arith.constant 0 : index
    %9 = vector.load %arg3[%8, %c0_2] : memref<128x128xbf16, #tpu.memory_space<vmem>>, vector<128x128xbf16>
    %c0_3 = arith.constant 0 : index
    %c0_4 = arith.constant 0 : index
    %10 = vector.load %arg8[%c0_3, %c0_4] : memref<128x128xf32, #tpu.memory_space<vmem>>, vector<128x128xf32>
    %cst = arith.constant dense<0.000000e+00> : vector<128x128xf32>
    %11 = tpu.matmul %5, %9, %cst {dimension_numbers = #tpu.dot_dimension_numbers<[1], [0], [0], [1], [0, 0, 1, 1], [], []>} : vector<128x128xbf16>, vector<128x128xbf16>, vector<128x128xf32> -> vector<128x128xf32>
    %12 = arith.addf %10, %11 : vector<128x128xf32>
    %c0_5 = arith.constant 0 : index
    %c0_6 = arith.constant 0 : index
    %13 = vector.load %arg8[%c0_5, %c0_6] : memref<128x128xf32, #tpu.memory_space<vmem>>, vector<128x128xf32>
    tpu.vector_store %arg8[%c0_5, %c0_6], %12 {strides = array<i32>} : memref<128x128xf32, #tpu.memory_space<vmem>>, vector<128x128xf32>,
    %c0_i32_7 = arith.constant 0 : i32
    %14 = arith.cmpi eq, %arg1, %c0_i32_7 : i32
    %15 = arith.extui %14 : i1 to i32
    %c0_i32_8 = arith.constant 0 : i32
    %16 = arith.cmpi ne, %15, %c0_i32_8 : i32
    scf.if %16 {
      %c0_9 = arith.constant 0 : index
      %c0_10 = arith.constant 0 : index
      %17 = vector.load %arg4[%c0_9, %c0_10] : memref<128x1xf32, #tpu.memory_space<vmem>>, vector<128x1xf32>
      %c0_11 = arith.constant 0 : index
      %c0_12 = arith.constant 0 : index
      %18 = vector.load %arg8[%c0_11, %c0_12] : memref<128x128xf32, #tpu.memory_space<vmem>>, vector<128x128xf32>
      %19 = vector.broadcast %17 : vector<128x1xf32> to vector<128x128xf32>
      %20 = arith.mulf %18, %19 : vector<128x128xf32>
      %c0_13 = arith.constant 0 : index
      %c0_14 = arith.constant 0 : index
      %21 = vector.load %arg5[%c0_13, %c0_14] : memref<1x128xf32, #tpu.memory_space<vmem>>, vector<1x128xf32>
      %22 = vector.broadcast %21 : vector<1x128xf32> to vector<128x128xf32>
      %23 = arith.addf %20, %22 : vector<128x128xf32>
      %cst_15 = arith.constant 0.000000e+00 : f32
      %24 = vector.broadcast %cst_15 : f32 to vector<128x128xf32>
      %25 = arith.maximumf %23, %24 : vector<128x128xf32>
      %26 = arith.truncf %25 : vector<128x128xf32> to vector<128x128xbf16>
      %c0_16 = arith.constant 0 : index
      %c0_17 = arith.constant 0 : index
      %27 = vector.load %arg6[%c0_16, %c0_17] : memref<128x64xbf16, #tpu.memory_space<vmem>>, vector<128x64xbf16>
      %cst_18 = arith.constant dense<0.000000e+00> : vector<128x64xf32>
      %28 = tpu.matmul %26, %27, %cst_18 {dimension_numbers = #tpu.dot_dimension_numbers<[1], [0], [0], [1], [0, 0, 1, 1], [], []>} : vector<128x128xbf16>, vector<128x64xbf16>, vector<128x64xf32> -> vector<128x64xf32>
      %29 = vector.broadcast %17 : vector<128x1xf32> to vector<128x64xf32>
      %30 = arith.mulf %28, %29 : vector<128x64xf32>
      %31 = arith.truncf %30 : vector<128x64xf32> to vector<128x64xbf16>
      %c0_19 = arith.constant 0 : index
      %c0_20 = arith.constant 0 : index
      %32 = vector.load %arg7[%c0_19, %c0_20] : memref<128x64xbf16, #tpu.memory_space<vmem>>, vector<128x64xbf16>
      tpu.vector_store %arg7[%c0_19, %c0_20], %31 {strides = array<i32>} : memref<128x64xbf16, #tpu.memory_space<vmem>>, vector<128x64xbf16>,
    } else {
    }
    return
  }
  func.func @transform_0(%arg0: i32, %arg1: i32) -> (i32, i32) {
    %c0_i32 = arith.constant 0 : i32
    return %arg0, %arg1 : i32, i32
  }
  func.func @transform_1(%arg0: i32, %arg1: i32) -> (i32, i32) {
    %c0_i32 = arith.constant 0 : i32
    %c0_i32_0 = arith.constant 0 : i32
    %c0_i32_1 = arith.constant 0 : i32
    return %c0_i32, %c0_i32_0 : i32, i32
  }
  func.func @transform_2(%arg0: i32, %arg1: i32) -> (i32, i32) {
    %c0_i32 = arith.constant 0 : i32
    %c0_i32_0 = arith.constant 0 : i32
    return %arg0, %c0_i32 : i32, i32
  }
  func.func @transform_3(%arg0: i32, %arg1: i32) -> (i32, i32) {
    %c0_i32 = arith.constant 0 : i32
    %c0_i32_0 = arith.constant 0 : i32
    %c0_i32_1 = arith.constant 0 : i32
    return %c0_i32, %c0_i32_0 : i32, i32
  }
  func.func @transform_4(%arg0: i32, %arg1: i32) -> (i32, i32) {
    %c0_i32 = arith.constant 0 : i32
    %c0_i32_0 = arith.constant 0 : i32
    %c0_i32_1 = arith.constant 0 : i32
    return %c0_i32, %c0_i32_0 : i32, i32
  }
  func.func @transform_5(%arg0: i32, %arg1: i32) -> (i32, i32) {
    %c0_i32 = arith.constant 0 : i32
    %c0_i32_0 = arith.constant 0 : i32
    return %arg0, %c0_i32 : i32, i32
  }
}

module attributes {stable_mosaic.version = 11 : i64} {
  func.func @gcn_layer2_kernel(%arg0: i32, %arg1: i32, %arg2: memref<128x128xi8, #tpu.memory_space<vmem>>, %arg3: memref<128x64xbf16, #tpu.memory_space<vmem>>, %arg4: memref<128x1xf32, #tpu.memory_space<vmem>>, %arg5: memref<1x64xf32, #tpu.memory_space<vmem>>, %arg6: memref<8x64xf32, #tpu.memory_space<vmem>>, %arg7: memref<128x64xf32, #tpu.memory_space<vmem>>) attributes {dimension_semantics = [#tpu.dimension_semantics<parallel>, #tpu.dimension_semantics<arbitrary>], iteration_bounds = array<i64: 1, 1>, scalar_prefetch = 0 : i64, scratch_operands = 1 : i64, tpu.core_type = #tpu.core_type<tc>, window_params = [{transform_indices = @transform_0, window_bounds = array<i64: 128, 128>}, {pipeline_mode = #tpu.pipeline_mode<synchronous>, transform_indices = @transform_1, window_bounds = array<i64: 128, 64>}, {transform_indices = @transform_2, window_bounds = array<i64: 128, 1>}, {pipeline_mode = #tpu.pipeline_mode<synchronous>, transform_indices = @transform_3, window_bounds = array<i64: 1, 64>}, {transform_indices = @transform_4, window_bounds = array<i64: 8, 64>}]} {
    %c0_i32 = arith.constant 0 : i32
    %0 = arith.cmpi eq, %arg1, %c0_i32 : i32
    %1 = arith.extui %0 : i1 to i32
    %c0_i32_0 = arith.constant 0 : i32
    %2 = arith.cmpi ne, %1, %c0_i32_0 : i32
    scf.if %2 {
      %cst_9 = arith.constant 0.000000e+00 : f32
      %17 = vector.broadcast %cst_9 : f32 to vector<128x64xf32>
      %c0_10 = arith.constant 0 : index
      %c0_11 = arith.constant 0 : index
      %18 = vector.load %arg7[%c0_10, %c0_11] : memref<128x64xf32, #tpu.memory_space<vmem>>, vector<128x64xf32>
      tpu.vector_store %arg7[%c0_10, %c0_11], %17 {strides = array<i32>} : memref<128x64xf32, #tpu.memory_space<vmem>>, vector<128x64xf32>,
    } else {
    }
    %c0 = arith.constant 0 : index
    %c0_1 = arith.constant 0 : index
    %3 = vector.load %arg2[%c0, %c0_1] : memref<128x128xi8, #tpu.memory_space<vmem>>, vector<128x128xi8>
    %4 = arith.sitofp %3 : vector<128x128xi8> to vector<128x128xf32>
    %5 = arith.truncf %4 : vector<128x128xf32> to vector<128x128xbf16>
    %c128_i32 = arith.constant 128 : i32
    %6 = arith.muli %arg1, %c128_i32 : i32
    %7 = tpu.assume_multiple %6, 128 : i32
    %8 = arith.index_cast %7 : i32 to index
    %c0_2 = arith.constant 0 : index
    %9 = vector.load %arg3[%8, %c0_2] : memref<128x64xbf16, #tpu.memory_space<vmem>>, vector<128x64xbf16>
    %c0_3 = arith.constant 0 : index
    %c0_4 = arith.constant 0 : index
    %10 = vector.load %arg7[%c0_3, %c0_4] : memref<128x64xf32, #tpu.memory_space<vmem>>, vector<128x64xf32>
    %cst = arith.constant dense<0.000000e+00> : vector<128x64xf32>
    %11 = tpu.matmul %5, %9, %cst {dimension_numbers = #tpu.dot_dimension_numbers<[1], [0], [0], [1], [0, 0, 1, 1], [], []>} : vector<128x128xbf16>, vector<128x64xbf16>, vector<128x64xf32> -> vector<128x64xf32>
    %12 = arith.addf %10, %11 : vector<128x64xf32>
    %c0_5 = arith.constant 0 : index
    %c0_6 = arith.constant 0 : index
    %13 = vector.load %arg7[%c0_5, %c0_6] : memref<128x64xf32, #tpu.memory_space<vmem>>, vector<128x64xf32>
    tpu.vector_store %arg7[%c0_5, %c0_6], %12 {strides = array<i32>} : memref<128x64xf32, #tpu.memory_space<vmem>>, vector<128x64xf32>,
    %c0_i32_7 = arith.constant 0 : i32
    %14 = arith.cmpi eq, %arg1, %c0_i32_7 : i32
    %15 = arith.extui %14 : i1 to i32
    %c0_i32_8 = arith.constant 0 : i32
    %16 = arith.cmpi ne, %15, %c0_i32_8 : i32
    scf.if %16 {
      %c0_9 = arith.constant 0 : index
      %c0_10 = arith.constant 0 : index
      %17 = vector.load %arg7[%c0_9, %c0_10] : memref<128x64xf32, #tpu.memory_space<vmem>>, vector<128x64xf32>
      %c0_11 = arith.constant 0 : index
      %c0_12 = arith.constant 0 : index
      %18 = vector.load %arg4[%c0_11, %c0_12] : memref<128x1xf32, #tpu.memory_space<vmem>>, vector<128x1xf32>
      %19 = vector.broadcast %18 : vector<128x1xf32> to vector<128x64xf32>
      %20 = arith.mulf %17, %19 : vector<128x64xf32>
      %c0_13 = arith.constant 0 : index
      %c0_14 = arith.constant 0 : index
      %21 = vector.load %arg5[%c0_13, %c0_14] : memref<1x64xf32, #tpu.memory_space<vmem>>, vector<1x64xf32>
      %22 = vector.broadcast %21 : vector<1x64xf32> to vector<128x64xf32>
      %23 = arith.addf %20, %22 : vector<128x64xf32>
      %cst_15 = arith.constant 0.000000e+00 : f32
      %24 = vector.broadcast %cst_15 : f32 to vector<128x64xf32>
      %25 = arith.maximumf %23, %24 : vector<128x64xf32>
      %c0_16 = arith.constant 0 : index
      %c0_17 = arith.constant 0 : index
      %26 = vector.load %arg7[%c0_16, %c0_17] : memref<128x64xf32, #tpu.memory_space<vmem>>, vector<128x64xf32>
      tpu.vector_store %arg7[%c0_16, %c0_17], %25 {strides = array<i32>} : memref<128x64xf32, #tpu.memory_space<vmem>>, vector<128x64xf32>,
      %c0_i32_18 = arith.constant 0 : i32
      %27 = arith.cmpi eq, %arg0, %c0_i32_18 : i32
      %28 = arith.extui %27 : i1 to i32
      %c0_i32_19 = arith.constant 0 : i32
      %29 = arith.cmpi ne, %28, %c0_i32_19 : i32
      scf.if %29 {
        %c128_i32_27 = arith.constant 128 : i32
        %41 = arith.muli %arg0, %c128_i32_27 : i32
        %42 = tpu.iota {dimensions = array<i32: 0>} : vector<128x64xi32>
        %43 = vector.broadcast %41 : i32 to vector<128x64xi32>
        %44 = arith.addi %43, %42 : vector<128x64xi32>
        %c16_i32 = arith.constant 16 : i32
        %45 = vector.broadcast %c16_i32 : i32 to vector<128x64xi32>
        %46 = arith.cmpi slt, %44, %45 : vector<128x64xi32>
        %c0_28 = arith.constant 0 : index
        %c0_29 = arith.constant 0 : index
        %47 = vector.load %arg7[%c0_28, %c0_29] : memref<128x64xf32, #tpu.memory_space<vmem>>, vector<128x64xf32>
        %cst_30 = arith.constant 0.000000e+00 : f32
        %48 = vector.broadcast %cst_30 : f32 to vector<128x64xf32>
        %49 = arith.select %46, %47, %48 : vector<128x64xi1>, vector<128x64xf32>
        %c0_31 = arith.constant 0 : index
        %c0_32 = arith.constant 0 : index
        %50 = vector.load %arg7[%c0_31, %c0_32] : memref<128x64xf32, #tpu.memory_space<vmem>>, vector<128x64xf32>
        tpu.vector_store %arg7[%c0_31, %c0_32], %49 {strides = array<i32>} : memref<128x64xf32, #tpu.memory_space<vmem>>, vector<128x64xf32>,
      } else {
      }
      %c0_20 = arith.constant 0 : index
      %c0_21 = arith.constant 0 : index
      %30 = vector.load %arg7[%c0_20, %c0_21] : memref<128x64xf32, #tpu.memory_space<vmem>>, vector<128x64xf32>
      %cst_22 = arith.constant dense<0.000000e+00> : vector<64xf32>
      %31 = vector.multi_reduction <add>, %30, %cst_22 [0] : vector<128x64xf32> to vector<64xf32>
      %32 = vector.shape_cast %31 : vector<64xf32> to vector<1x64xf32>
      %33 = tpu.iota {dimensions = array<i32: 0>} : vector<8x64xi32>
      %c0_i32_23 = arith.constant 0 : i32
      %34 = vector.broadcast %c0_i32_23 : i32 to vector<8x64xi32>
      %35 = arith.cmpi eq, %33, %34 : vector<8x64xi32>
      %cst_24 = arith.constant 0.000000e+00 : f32
      %36 = vector.shape_cast %32 : vector<1x64xf32> to vector<1x64xf32>
      %37 = vector.broadcast %36 : vector<1x64xf32> to vector<8x64xf32>
      %38 = vector.broadcast %cst_24 : f32 to vector<8x64xf32>
      %39 = arith.select %35, %37, %38 : vector<8x64xi1>, vector<8x64xf32>
      %c0_25 = arith.constant 0 : index
      %c0_26 = arith.constant 0 : index
      %40 = vector.load %arg6[%c0_25, %c0_26] : memref<8x64xf32, #tpu.memory_space<vmem>>, vector<8x64xf32>
      tpu.vector_store %arg6[%c0_25, %c0_26], %39 {strides = array<i32>} : memref<8x64xf32, #tpu.memory_space<vmem>>, vector<8x64xf32>,
    } else {
    }
    return
  }
  func.func @transform_0(%arg0: i32, %arg1: i32) -> (i32, i32) {
    %c0_i32 = arith.constant 0 : i32
    return %arg0, %arg1 : i32, i32
  }
  func.func @transform_1(%arg0: i32, %arg1: i32) -> (i32, i32) {
    %c0_i32 = arith.constant 0 : i32
    %c0_i32_0 = arith.constant 0 : i32
    %c0_i32_1 = arith.constant 0 : i32
    return %c0_i32, %c0_i32_0 : i32, i32
  }
  func.func @transform_2(%arg0: i32, %arg1: i32) -> (i32, i32) {
    %c0_i32 = arith.constant 0 : i32
    %c0_i32_0 = arith.constant 0 : i32
    return %arg0, %c0_i32 : i32, i32
  }
  func.func @transform_3(%arg0: i32, %arg1: i32) -> (i32, i32) {
    %c0_i32 = arith.constant 0 : i32
    %c0_i32_0 = arith.constant 0 : i32
    %c0_i32_1 = arith.constant 0 : i32
    return %c0_i32, %c0_i32_0 : i32, i32
  }
  func.func @transform_4(%arg0: i32, %arg1: i32) -> (i32, i32) {
    %c0_i32 = arith.constant 0 : i32
    %c0_i32_0 = arith.constant 0 : i32
    return %arg0, %c0_i32 : i32, i32
  }
}

</mosaic_0001>

<bundles_post_ra>
// kernel: gnn_forward.2
= control target key start
LH: loop header
LB: loop body
LE: loop exit
PB: predicated region body
PF: predicated region fallthrough
CT: control target
= control target key end

     0   :  { %v745_v1 = vmov 0   ;;  %vm582_vm0 = vcmask 519168   ;;  %s1033_s1 = inlined_call_operand.vmem [shape: bf16[128,128], index: 1, kind: input, shape index: {}]   ;;  %s1034_s2 = inlined_call_operand.vmem [shape: f32[128,1], index: 2, kind: input, shape index: {}]   ;;  %s1035_s0 = inlined_call_operand.vmem [shape: s8[128,128], index: 0, kind: input, shape index: {}]   ;;  %s1036_s3 = inlined_call_operand.vmem [shape: f32[1,128], index: 3, kind: input, shape index: {}]   ;;  %s1037_s4 = inlined_call_operand.vmem [shape: bf16[128,64], index: 4, kind: input, shape index: {}]   ;;  %s1038_s5 = inlined_call_operand.vmem [shape: bf16[128,64], index: 5, kind: output, shape index: {}]  }
   0x1   :  { %v676_v0 = vld [vmem:[%s1033_s1 + $0x38] sm:$0xff]  ;;  %741 = vset.pattern.permute.xlu0 %v745_v1  ;;  %v273_v2 = vld [vmem:[%s1034_s2 + $0x40] sm:$0xff]  ;;  %742 = vset.pattern.permute.xlu1 %v745_v1  ;;  %v675_v3 = vld [vmem:[%s1033_s1 + $0x30] sm:$0xff] }
   0x2   :  { %339 = vperm.xlu0 %741, %v273_v2   ;;  %743 = vset.pattern.permute.xlu2 %v745_v1  ;;  %v265_v4 = vld [vmem:[%s1034_s2] sm:$0xff]  ;;  %v674_v5 = vld [vmem:[%s1033_s1 + $0x28] sm:$0xff]  ;;  %v672_v9 = vld [vmem:[%s1033_s1 + $0x18] sm:$0xff] }
   0x3   :  { %181 = vmatpush.bf16.msra.mxu0 %v676_v0  ;;  %717 = vmatpush.bf16.msra.mxu2 %v676_v0  ;;  %v274_v6 = vld [vmem:[%s1034_s2 + $0x48] sm:$0xff]  ;;  %v673_v8 = vld [vmem:[%s1033_s1 + $0x20] sm:$0xff]  ;;  %v267_v10 = vld [vmem:[%s1034_s2 + $0x10] sm:$0xff] }
   0x4   :  { %299 = vperm.xlu1 %742, %v265_v4   ;;  %v266_v7 = vld [vmem:[%s1034_s2 + $0x8] sm:$0xff]  ;;  %v268_v11 = vld [vmem:[%s1034_s2 + $0x18] sm:$0xff]  ;;  %v275_v12 = vld [vmem:[%s1034_s2 + $0x50] sm:$0xff] }
   0x5   :  { %v671_v13 = vld [vmem:[%s1033_s1 + $0x10] sm:$0xff]  ;;  %v686_v14 = vld [vmem:[%s1035_s0] sm:$0xff]   ;;  %349 = vperm.xlu2 %743, %v275_v12   ;;  %v670_v20 = vld [vmem:[%s1033_s1 + $0x8] sm:$0xff] }
   0x6   :  { %v736_v15 = vld [vmem:[%s1035_s0 + $0x10] sm:$0xff]   ;;  %v687_v16 = vunpack.c.0.s8 %v686_v14  ;;  %v688_v17 = vunpack.c.1.s8 %v686_v14  ;;  %v278_v21 = vld [vmem:[%s1034_s2 + $0x68] sm:$0xff]  ;;  %v269_v22 = vld [vmem:[%s1034_s2 + $0x20] sm:$0xff]  ;;  %v691_v33 = vunpack.c.2.s8 %v686_v14  ;;  %v692_v34 = vunpack.c.3.s8 %v686_v14 }
   0x7   :  { %182 = vmatpush.bf16.msra.mxu0 %v675_v3  ;;  %718 = vmatpush.bf16.msra.mxu2 %v675_v3  ;;  %v703_v18 = vunpack.c.0.s8 %v736_v15  ;;  %v704_v19 = vunpack.c.1.s8 %v736_v15  ;;  %v669_v27 = vld [vmem:[%s1033_s1] sm:$0xff]  ;;  %v279_v30 = vld [vmem:[%s1034_s2 + $0x70] sm:$0xff]  ;;  %v280_v31 = vld [vmem:[%s1034_s2 + $0x78] sm:$0xff]  ;;  %v707_v35 = vunpack.c.2.s8 %v736_v15  ;;  %v708_v36 = vunpack.c.3.s8 %v736_v15 }
   0x8   :  { %v72_v23 = vcvt.s32.f32 %v687_v16  ;;  %v73_v24 = vcvt.s32.f32 %v688_v17  ;;  %v276_v32 = vld [vmem:[%s1034_s2 + $0x58] sm:$0xff]  ;;  %v277_v38 = vld [vmem:[%s1034_s2 + $0x60] sm:$0xff]  ;;  %v74_v39 = vcvt.s32.f32 %v691_v33  ;;  %v75_v40 = vcvt.s32.f32 %v692_v34  ;;  %v270_v45 = vld [vmem:[%s1034_s2 + $0x28] sm:$0xff] }
   0x9   :  { %v80_v25 = vcvt.s32.f32 %v703_v18  ;;  %v81_v26 = vcvt.s32.f32 %v704_v19  ;;  %v272_v37 = vld [vmem:[%s1034_s2 + $0x38] sm:$0xff]  ;;  %v82_v41 = vcvt.s32.f32 %v707_v35  ;;  %v83_v42 = vcvt.s32.f32 %v708_v36  ;;  %v734_v46 = vld [vmem:[%s1035_s0 + $0x8] sm:$0xff]   ;;  %v271_v52 = vld [vmem:[%s1034_s2 + $0x30] sm:$0xff] }
   0xa   :  { %344 = vperm.xlu0 %741, %v274_v6   ;;  %v88_v28 = vpack.c.bf16 %v73_v24, %v72_v23  ;;  %v89_v43 = vpack.c.bf16 %v75_v40, %v74_v39  ;;  %v738_v47 = vld [vmem:[%s1035_s0 + $0x18] sm:$0xff]   ;;  %v695_v48 = vunpack.c.0.s8 %v734_v46  ;;  %v696_v49 = vunpack.c.1.s8 %v734_v46  ;;  %v683_v6 = vld [vmem:[%s1037_s4 + $0x30] sm:$0xff]  ;;  %v677_v12 = vld [vmem:[%s1037_s4] sm:$0xff] }
   0xb   :  { %183 = vmatpush.bf16.msra.mxu0 %v674_v5  ;;  %719 = vmatpush.bf16.msra.mxu2 %v674_v5  ;;  %v92_v29 = vpack.c.bf16 %v81_v26, %v80_v25  ;;  %v93_v44 = vpack.c.bf16 %v83_v42, %v82_v41  ;;  %v711_v50 = vunpack.c.0.s8 %v738_v47  ;;  %v712_v51 = vunpack.c.1.s8 %v738_v47  ;;  %v684_v5 = vld [vmem:[%s1037_s4 + $0x38] sm:$0xff]  ;;  %v892_v17 = vld [vmem:[%s1036_s3] ss:$0 sm:$0xff] }
   0xc   :  { %304 = vperm.xlu1 %742, %v266_v7   ;;  %v76_v53 = vcvt.s32.f32 %v695_v48  ;;  %v77_v54 = vcvt.s32.f32 %v696_v49  ;;  %v699_v59 = vunpack.c.2.s8 %v734_v46  ;;  %v700_v60 = vunpack.c.3.s8 %v734_v46  ;;  %501 = vmatpush.bf16.msra.mxu1 %v684_v5  ;;  %v682_v7 = vld [vmem:[%s1037_s4 + $0x28] sm:$0xff] }
   0xd   :  { %354 = vperm.xlu2 %743, %v276_v32   ;;  %v84_v55 = vcvt.s32.f32 %v711_v50  ;;  %v85_v56 = vcvt.s32.f32 %v712_v51  ;;  %v715_v61 = vunpack.c.2.s8 %v738_v47  ;;  %v716_v62 = vunpack.c.3.s8 %v738_v47  ;;  %725 = vmatpush.bf16.msra.mxu3 %v684_v5 }
   0xe   :  { %v90_v57 = vpack.c.bf16 %v77_v54, %v76_v53  ;;  %v78_v63 = vcvt.s32.f32 %v699_v59  ;;  %v79_v0 = vcvt.s32.f32 %v700_v60 }
   0xf   :  { %184 = vmatpush.bf16.msra.mxu0 %v673_v8  ;;  %720 = vmatpush.bf16.msra.mxu2 %v673_v8  ;;  %v94_v58 = vpack.c.bf16 %v85_v56, %v84_v55  ;;  %v86_v1 = vcvt.s32.f32 %v715_v61  ;;  %v87_v2 = vcvt.s32.f32 %v716_v62  ;;  %v681_v8 = vld [vmem:[%s1037_s4 + $0x20] sm:$0xff] }
  0x10   :  { %v91_v3 = vpack.c.bf16 %v79_v0, %v78_v63  ;;  %502 = vmatpush.bf16.msra.mxu1 %v683_v6 }
  0x11   :  { %v95_v4 = vpack.c.bf16 %v87_v2, %v86_v1  ;;  %726 = vmatpush.bf16.msra.mxu3 %v683_v6 }
  0x12   :  { %309 = vperm.xlu0 %741, %v267_v10   ;;  %v679_v10 = vld [vmem:[%s1037_s4 + $0x10] sm:$0xff] }
  0x13   :  { %185 = vmatpush.bf16.msra.mxu0 %v672_v9  ;;  %721 = vmatpush.bf16.msra.mxu2 %v672_v9  ;;  %v680_v9 = vld [vmem:[%s1037_s4 + $0x18] sm:$0xff] }
  0x14   :  { %314 = vperm.xlu1 %742, %v268_v11   ;;  %503 = vmatpush.bf16.msra.mxu1 %v682_v7  ;;  %v678_v11 = vld [vmem:[%s1037_s4 + $0x8] sm:$0xff] }
  0x15   :  { %359 = vperm.xlu2 %743, %v277_v38   ;;  %727 = vmatpush.bf16.msra.mxu3 %v682_v7 }
  0x17   :  { %186 = vmatpush.bf16.msra.mxu0 %v671_v13  ;;  %722 = vmatpush.bf16.msra.mxu2 %v671_v13 }
  0x18   :  { %504 = vmatpush.bf16.msra.mxu1 %v681_v8 }
  0x19   :  { %728 = vmatpush.bf16.msra.mxu3 %v681_v8 }
  0x1a   :  { %364 = vperm.xlu0 %741, %v278_v21  }
  0x1b   :  { %187 = vmatpush.bf16.msra.mxu0 %v670_v20  ;;  %723 = vmatpush.bf16.msra.mxu2 %v670_v20 }
  0x1c   :  { %319 = vperm.xlu1 %742, %v269_v22   ;;  %505 = vmatpush.bf16.msra.mxu1 %v680_v9 }
  0x1d   :  { %324 = vperm.xlu2 %743, %v270_v45   ;;  %729 = vmatpush.bf16.msra.mxu3 %v680_v9 }
  0x1f   :  { %188 = vmatpush.bf16.msra.mxu0 %v669_v27  ;;  %724 = vmatpush.bf16.msra.mxu2 %v669_v27 }
  0x20   :  { %506 = vmatpush.bf16.msra.mxu1 %v679_v10 }
  0x21   :  { %730 = vmatpush.bf16.msra.mxu3 %v679_v10 }
  0x22   :  { %189 = vmatmul.bf16.vlgmr.msra.gmra.mxu0 %v88_v28  ;;  %209 = vmatmul.bf16.vlgmr.msra.gmra.mxu2 %v92_v29 }
  0x23   :  { %369 = vperm.xlu0 %741, %v279_v30  }
  0x24   :  { %374 = vperm.xlu1 %742, %v280_v31   ;;  %507 = vmatpush.bf16.msra.mxu1 %v678_v11 }
  0x25   :  { %329 = vperm.xlu2 %743, %v271_v52   ;;  %731 = vmatpush.bf16.msra.mxu3 %v678_v11 }
  0x28   :  { %508 = vmatpush.bf16.msra.mxu1 %v677_v12 }
  0x29   :  { %732 = vmatpush.bf16.msra.mxu3 %v677_v12 }
  0x2b   :  { %334 = vperm.xlu0 %741, %v272_v37  }
  0x32   :  { %194 = vmatmul.bf16.gmra.mxu0 %v89_v43  ;;  %214 = vmatmul.bf16.gmra.mxu2 %v93_v44 }
  0x42   :  { %199 = vmatmul.bf16.gmra.mxu0 %v90_v57  ;;  %219 = vmatmul.bf16.gmra.mxu2 %v94_v58 }
  0x52   :  { %204 = vmatmul.bf16.gmra.mxu0 %v91_v3  ;;  %224 = vmatmul.bf16.gmra.mxu2 %v95_v4 }
  0x5f   :  { %v900_v24 = vpop.permute.xlu2 %349 }
  0x67   :  { %v909_v38 = vpop.permute.xlu2 %354 }
  0x6f   :  { %v918_v50 = vpop.permute.xlu2 %359 }
  0x74   :  { %v886_v14 = vpop.permute.xlu0 %339 }
  0x76   :  { %v884_v13 = vpop.permute.xlu1 %299 }
  0x77   :  { %v928_v0 = vpop.permute.xlu2 %324 }
  0x7c   :  { %v898_v23 = vpop.permute.xlu0 %344 }
  0x7e   :  { %v895_v20 = vpop.permute.xlu1 %304 }
  0x84   :  { %v907_v37 = vpop.permute.xlu0 %309 }
  0x86   :  { %v912_v42 = vpop.permute.xlu1 %314 }
  0x8c   :  { %v923_v59 = vpop.permute.xlu0 %364 }
  0x8e   :  { %v925_v60 = vpop.permute.xlu1 %319 }
  0x95   :  { %v934_v8 = vpop.permute.xlu0 %369 }
  0x9f   :  { %v190_v15 = vpop.f32.mrf.mxu0 }
  0xa0   :  { %v377_v16 = vmul.f32 %v884_v13, %v190_v15 }
  0xa2   :  { %v397_v19 = vadd.f32 %v892_v17, %v377_v16 }
  0xa4   :  { %v413_v25 = vmax.f32 %v397_v19, 0.0 }
  0xa5   :  { %v210_v18 = vpop.f32.mrf.mxu2 }
  0xa6   :  { %v385_v26 = vmul.f32 %v886_v14, %v210_v18 }
  0xa7   :  { %v192_v21 = vpop.f32.mrf.mxu0 }
  0xa8   :  { %v378_v22 = vmul.f32 %v895_v20, %v192_v21  ;;  %v405_v30 = vadd.f32 %v892_v17, %v385_v26  ;;  %v939_v21 = vpop.permute.xlu2 %329 }
  0xaa   :  { %v398_v27 = vadd.f32 %v892_v17, %v378_v22  ;;  %v421_v35 = vmax.f32 %v405_v30, 0.0 }
  0xac   :  { %v414_v28 = vmax.f32 %v398_v27, 0.0  ;;  %v942_v27 = vpop.permute.xlu0 %334 }
  0xad   :  { %v212_v29 = vpop.f32.mrf.mxu2 }
  0xae   :  { %v386_v31 = vmul.f32 %v898_v23, %v212_v29  ;;  %v429_v32 = vpack.c.bf16 %v414_v28, %v413_v25 }
  0xaf   :  { %v195_v33 = vpop.f32.mrf.mxu0 }
  0xb0   :  { %v406_v34 = vadd.f32 %v892_v17, %v386_v31  ;;  %509 = vmatmul.bf16.vlgmr.msra.gmra.mxu1 %v429_v32  ;;  %v379_v39 = vmul.f32 %v907_v37, %v195_v33 }
  0xb2   :  { %v422_v36 = vmax.f32 %v406_v34, 0.0  ;;  %v399_v44 = vadd.f32 %v892_v17, %v379_v39 }
  0xb4   :  { %v433_v40 = vpack.c.bf16 %v422_v36, %v421_v35  ;;  %v415_v48 = vmax.f32 %v399_v44, 0.0  ;;  %v948_v35 = vpop.permute.xlu1 %374 }
  0xb5   :  { %v215_v41 = vpop.f32.mrf.mxu2 }
  0xb6   :  { %529 = vmatmul.bf16.vlgmr.msra.gmra.mxu3 %v433_v40  ;;  %v387_v46 = vmul.f32 %v900_v24, %v215_v41 }
  0xb7   :  { %v197_v43 = vpop.f32.mrf.mxu0 }
  0xb8   :  { %v380_v45 = vmul.f32 %v912_v42, %v197_v43  ;;  %v407_v52 = vadd.f32 %v892_v17, %v387_v46 }
  0xba   :  { %v400_v47 = vadd.f32 %v892_v17, %v380_v45  ;;  %v423_v57 = vmax.f32 %v407_v52, 0.0 }
  0xbc   :  { %v416_v49 = vmax.f32 %v400_v47, 0.0 }
  0xbd   :  { %v217_v51 = vpop.f32.mrf.mxu2 }
  0xbe   :  { %v388_v53 = vmul.f32 %v909_v38, %v217_v51  ;;  %v430_v54 = vpack.c.bf16 %v416_v49, %v415_v48 }
  0xbf   :  { %v200_v55 = vpop.f32.mrf.mxu0 }
  0xc0   :  { %v408_v56 = vadd.f32 %v892_v17, %v388_v53  ;;  %514 = vmatmul.bf16.gmra.mxu1 %v430_v54  ;;  %v381_v61 = vmul.f32 %v925_v60, %v200_v55 }
  0xc2   :  { %v424_v58 = vmax.f32 %v408_v56, 0.0  ;;  %v401_v2 = vadd.f32 %v892_v17, %v381_v61 }
  0xc4   :  { %v434_v62 = vpack.c.bf16 %v424_v58, %v423_v57  ;;  %v417_v6 = vmax.f32 %v401_v2, 0.0 }
  0xc5   :  { %v220_v63 = vpop.f32.mrf.mxu2 }
  0xc6   :  { %534 = vmatmul.bf16.gmra.mxu3 %v434_v62  ;;  %v389_v4 = vmul.f32 %v918_v50, %v220_v63 }
  0xc7   :  { %v202_v1 = vpop.f32.mrf.mxu0 }
  0xc8   :  { %v382_v3 = vmul.f32 %v928_v0, %v202_v1  ;;  %v409_v10 = vadd.f32 %v892_v17, %v389_v4 }
  0xca   :  { %v402_v5 = vadd.f32 %v892_v17, %v382_v3  ;;  %v425_v18 = vmax.f32 %v409_v10, 0.0 }
  0xcc   :  { %v418_v7 = vmax.f32 %v402_v5, 0.0 }
  0xcd   :  { %v222_v9 = vpop.f32.mrf.mxu2 }
  0xce   :  { %v390_v11 = vmul.f32 %v923_v59, %v222_v9  ;;  %v431_v12 = vpack.c.bf16 %v418_v7, %v417_v6 }
  0xcf   :  { %v205_v15 = vpop.f32.mrf.mxu0 }
  0xd0   :  { %v410_v16 = vadd.f32 %v892_v17, %v390_v11  ;;  %519 = vmatmul.bf16.gmra.mxu1 %v431_v12  ;;  %v383_v22 = vmul.f32 %v939_v21, %v205_v15 }
  0xd2   :  { %v426_v19 = vmax.f32 %v410_v16, 0.0  ;;  %v403_v29 = vadd.f32 %v892_v17, %v383_v22 }
  0xd4   :  { %v435_v25 = vpack.c.bf16 %v426_v19, %v425_v18  ;;  %v419_v33 = vmax.f32 %v403_v29, 0.0 }
  0xd5   :  { %v225_v26 = vpop.f32.mrf.mxu2 }
  0xd6   :  { %539 = vmatmul.bf16.gmra.mxu3 %v435_v25  ;;  %v391_v31 = vmul.f32 %v934_v8, %v225_v26 }
  0xd7   :  { %v207_v28 = vpop.f32.mrf.mxu0 }
  0xd8   :  { %v384_v30 = vmul.f32 %v942_v27, %v207_v28  ;;  %v411_v39 = vadd.f32 %v892_v17, %v391_v31 }
  0xda   :  { %v404_v32 = vadd.f32 %v892_v17, %v384_v30  ;;  %v427_v44 = vmax.f32 %v411_v39, 0.0 }
  0xdc   :  { %v420_v34 = vmax.f32 %v404_v32, 0.0 }
  0xdd   :  { %v227_v36 = vpop.f32.mrf.mxu2 }
  0xde   :  { %v392_v40 = vmul.f32 %v948_v35, %v227_v36  ;;  %v432_v41 = vpack.c.bf16 %v420_v34, %v419_v33 }
  0xe0   :  { %v412_v43 = vadd.f32 %v892_v17, %v392_v40  ;;  %524 = vmatmul.bf16.gmra.mxu1 %v432_v41 }
  0xe2   :  { %v428_v45 = vmax.f32 %v412_v43, 0.0 }
  0xe4   :  { %v436_v46 = vpack.c.bf16 %v428_v45, %v427_v44 }
  0xe6   :  { %544 = vmatmul.bf16.gmra.mxu3 %v436_v46 }
 0x12d   :  { %v510_v47 = vpop.f32.mrf.mxu1 }
 0x12e   :  { %v550_v48 = vmul.f32 %v510_v47, %v884_v13 }
 0x130   :  { %v566_v49 = vpack.c.bf16 %v550_v48, %v550_v48 }
 0x132   :  { %583 = vst.msk [vmem:[%s1038_s5] sm:$0xf] %vm582_vm0, %v566_v49 }
 0x135   :  { %v512_v51 = vpop.f32.mrf.mxu1 }
 0x136   :  { %v551_v52 = vmul.f32 %v512_v51, %v895_v20 }
 0x138   :  { %v567_v53 = vpack.c.bf16 %v551_v52, %v551_v52 }
 0x139   :  { %v530_v17 = vpop.f32.mrf.mxu3 }
 0x13a   :  { %584 = vst.msk [vmem:[%s1038_s5 + $0x4] sm:$0xf] %vm582_vm0, %v567_v53  ;;  %v558_v54 = vmul.f32 %v530_v17, %v886_v14 }
 0x13c   :  { %v574_v13 = vpack.c.bf16 %v558_v54, %v558_v54 }
 0x13d   :  { %v515_v55 = vpop.f32.mrf.mxu1 }
 0x13e   :  { %591 = vst.msk [vmem:[%s1038_s5 + $0x20] sm:$0xf] %vm582_vm0, %v574_v13  ;;  %v552_v56 = vmul.f32 %v515_v55, %v907_v37 }
 0x140   :  { %v568_v57 = vpack.c.bf16 %v552_v56, %v552_v56 }
 0x141   :  { %v532_v20 = vpop.f32.mrf.mxu3 }
 0x142   :  { %585 = vst.msk [vmem:[%s1038_s5 + $0x8] sm:$0xf] %vm582_vm0, %v568_v57  ;;  %v559_v58 = vmul.f32 %v532_v20, %v898_v23 }
 0x144   :  { %v575_v61 = vpack.c.bf16 %v559_v58, %v559_v58 }
 0x145   :  { %v517_v14 = vpop.f32.mrf.mxu1 }
 0x146   :  { %592 = vst.msk [vmem:[%s1038_s5 + $0x24] sm:$0xf] %vm582_vm0, %v575_v61  ;;  %v553_v62 = vmul.f32 %v517_v14, %v912_v42 }
 0x148   :  { %v569_v63 = vpack.c.bf16 %v553_v62, %v553_v62 }
 0x149   :  { %v535_v37 = vpop.f32.mrf.mxu3 }
 0x14a   :  { %586 = vst.msk [vmem:[%s1038_s5 + $0xc] sm:$0xf] %vm582_vm0, %v569_v63  ;;  %v560_v1 = vmul.f32 %v535_v37, %v900_v24 }
 0x14c   :  { %v576_v2 = vpack.c.bf16 %v560_v1, %v560_v1 }
 0x14d   :  { %v520_v23 = vpop.f32.mrf.mxu1 }
 0x14e   :  { %593 = vst.msk [vmem:[%s1038_s5 + $0x28] sm:$0xf] %vm582_vm0, %v576_v2  ;;  %v554_v3 = vmul.f32 %v520_v23, %v925_v60 }
 0x150   :  { %v570_v4 = vpack.c.bf16 %v554_v3, %v554_v3 }
 0x151   :  { %v537_v42 = vpop.f32.mrf.mxu3 }
 0x152   :  { %587 = vst.msk [vmem:[%s1038_s5 + $0x10] sm:$0xf] %vm582_vm0, %v570_v4  ;;  %v561_v5 = vmul.f32 %v537_v42, %v909_v38 }
 0x154   :  { %v577_v6 = vpack.c.bf16 %v561_v5, %v561_v5 }
 0x155   :  { %v522_v24 = vpop.f32.mrf.mxu1 }
 0x156   :  { %594 = vst.msk [vmem:[%s1038_s5 + $0x2c] sm:$0xf] %vm582_vm0, %v577_v6  ;;  %v555_v7 = vmul.f32 %v522_v24, %v928_v0 }
 0x158   :  { %v571_v9 = vpack.c.bf16 %v555_v7, %v555_v7 }
 0x159   :  { %v540_v60 = vpop.f32.mrf.mxu3 }
 0x15a   :  { %588 = vst.msk [vmem:[%s1038_s5 + $0x14] sm:$0xf] %vm582_vm0, %v571_v9  ;;  %v562_v10 = vmul.f32 %v540_v60, %v918_v50 }
 0x15c   :  { %v578_v11 = vpack.c.bf16 %v562_v10, %v562_v10 }
 0x15d   :  { %v525_v38 = vpop.f32.mrf.mxu1 }
 0x15e   :  { %595 = vst.msk [vmem:[%s1038_s5 + $0x30] sm:$0xf] %vm582_vm0, %v578_v11  ;;  %v556_v12 = vmul.f32 %v525_v38, %v939_v21 }
 0x160   :  { %v572_v15 = vpack.c.bf16 %v556_v12, %v556_v12 }
 0x161   :  { %v542_v0 = vpop.f32.mrf.mxu3 }
 0x162   :  { %589 = vst.msk [vmem:[%s1038_s5 + $0x18] sm:$0xf] %vm582_vm0, %v572_v15  ;;  %v563_v16 = vmul.f32 %v542_v0, %v923_v59 }
 0x164   :  { %v579_v18 = vpack.c.bf16 %v563_v16, %v563_v16 }
 0x165   :  { %v527_v50 = vpop.f32.mrf.mxu1 }
 0x166   :  { %596 = vst.msk [vmem:[%s1038_s5 + $0x34] sm:$0xf] %vm582_vm0, %v579_v18  ;;  %v557_v19 = vmul.f32 %v527_v50, %v942_v27 }
 0x168   :  { %v573_v22 = vpack.c.bf16 %v557_v19, %v557_v19 }
 0x169   :  { %v545_v21 = vpop.f32.mrf.mxu3 }
 0x16a   :  { %590 = vst.msk [vmem:[%s1038_s5 + $0x1c] sm:$0xf] %vm582_vm0, %v573_v22  ;;  %v564_v25 = vmul.f32 %v545_v21, %v934_v8 }
 0x16c   :  { %v580_v26 = vpack.c.bf16 %v564_v25, %v564_v25 }
 0x16e   :  { %597 = vst.msk [vmem:[%s1038_s5 + $0x38] sm:$0xf] %vm582_vm0, %v580_v26 }
 0x171   :  { %v547_v59 = vpop.f32.mrf.mxu3 }
 0x172   :  { %v565_v28 = vmul.f32 %v547_v59, %v948_v35 }
 0x174   :  { %v581_v29 = vpack.c.bf16 %v565_v28, %v565_v28 }
 0x176   :  { %598 = vst.msk [vmem:[%s1038_s5 + $0x3c] sm:$0xf] %vm582_vm0, %v581_v29 }

// kernel: gnn_forward.3
= control target key start
LH: loop header
LB: loop body
LE: loop exit
PB: predicated region body
PF: predicated region fallthrough
CT: control target
= control target key end

     0   :  { %v720_v1 = vmov 0   ;;  %vm21_vm0 = vcmask 523264   ;;  %s1011_s1 = inlined_call_operand.vmem [shape: bf16[128,64], index: 1, kind: input, shape index: {}]   ;;  %s1012_s2 = inlined_call_operand.vmem [shape: f32[128,1], index: 2, kind: input, shape index: {}]   ;;  %s1013_s3 = inlined_call_operand.vmem [shape: f32[1,64], index: 3, kind: input, shape index: {}]   ;;  %s1014_s0 = inlined_call_operand.vmem [shape: s8[128,128], index: 0, kind: input, shape index: {}]   ;;  %s1015_s4 = inlined_call_operand.vmem [shape: f32[8,64], index: 4, kind: output, shape index: {}]  }
   0x1   :  { %v650_v0 = vld [vmem:[%s1011_s1 + $0x38] sm:$0xff]  ;;  %716 = vset.pattern.permute.xlu0 %v720_v1  ;;  %717 = vset.pattern.permute.xlu1 %v720_v1  ;;  %v280_v2 = vld [vmem:[%s1012_s2] sm:$0xff]  ;;  %v649_v3 = vld [vmem:[%s1011_s1 + $0x30] sm:$0xff] }
   0x2   :  { %718 = vset.pattern.permute.xlu2 %v720_v1  ;;  %179 = vmatpush.bf16.msra.mxu0 %v650_v0  ;;  %v282_v4 = vld [vmem:[%s1012_s2 + $0x10] sm:$0xff]  ;;  %v648_v5 = vld [vmem:[%s1011_s1 + $0x28] sm:$0xff]  ;;  %v647_v7 = vld [vmem:[%s1011_s1 + $0x20] sm:$0xff] }
   0x3   :  { %683 = vmatpush.bf16.msra.mxu1 %v650_v0  ;;  %684 = vmatpush.bf16.msra.mxu2 %v650_v0  ;;  %v281_v6 = vld [vmem:[%s1012_s2 + $0x8] sm:$0xff]  ;;  %v283_v8 = vld [vmem:[%s1012_s2 + $0x18] sm:$0xff]  ;;  %v645_v10 = vld [vmem:[%s1011_s1 + $0x10] sm:$0xff] }
   0x4   :  { %685 = vmatpush.bf16.msra.mxu3 %v650_v0  ;;  %298 = vperm.xlu0 %716, %v280_v2   ;;  %v646_v9 = vld [vmem:[%s1011_s1 + $0x18] sm:$0xff]  ;;  %v286_v11 = vld [vmem:[%s1012_s2 + $0x30] sm:$0xff]  ;;  %v783_v12 = vld [vmem:[%s1014_s0] sm:$0xff]  }
   0x5   :  { %308 = vperm.xlu1 %717, %v282_v4   ;;  %v788_v13 = vld [vmem:[%s1014_s0 + $0x8] sm:$0xff]   ;;  %v287_v14 = vld [vmem:[%s1012_s2 + $0x38] sm:$0xff]  ;;  %v796_v15 = vld [vmem:[%s1014_s0 + $0x10] sm:$0xff]   ;;  %v653_v18 = vunpack.c.0.s8 %v783_v12  ;;  %v654_v19 = vunpack.c.1.s8 %v783_v12  ;;  %v657_v46 = vunpack.c.2.s8 %v783_v12  ;;  %v658_v47 = vunpack.c.3.s8 %v783_v12 }
   0x6   :  { %180 = vmatpush.bf16.msra.mxu0 %v649_v3  ;;  %v801_v16 = vld [vmem:[%s1014_s0 + $0x18] sm:$0xff]   ;;  %v284_v17 = vld [vmem:[%s1012_s2 + $0x20] sm:$0xff]  ;;  %v661_v20 = vunpack.c.0.s8 %v788_v13  ;;  %v662_v21 = vunpack.c.1.s8 %v788_v13  ;;  %v644_v22 = vld [vmem:[%s1011_s1 + $0x8] sm:$0xff]  ;;  %v669_v23 = vunpack.c.0.s8 %v796_v15  ;;  %v670_v24 = vunpack.c.1.s8 %v796_v15 }
   0x7   :  { %686 = vmatpush.bf16.msra.mxu1 %v649_v3  ;;  %687 = vmatpush.bf16.msra.mxu2 %v649_v3  ;;  %v677_v25 = vunpack.c.0.s8 %v801_v16  ;;  %v678_v26 = vunpack.c.1.s8 %v801_v16  ;;  %v70_v27 = vcvt.s32.f32 %v653_v18  ;;  %v71_v28 = vcvt.s32.f32 %v654_v19  ;;  %v289_v31 = vld [vmem:[%s1012_s2 + $0x48] sm:$0xff]  ;;  %v643_v33 = vld [vmem:[%s1011_s1] sm:$0xff]  ;;  %v290_v38 = vld [vmem:[%s1012_s2 + $0x50] sm:$0xff] }
   0x8   :  { %688 = vmatpush.bf16.msra.mxu3 %v649_v3  ;;  %318 = vperm.xlu2 %718, %v284_v17   ;;  %v74_v29 = vcvt.s32.f32 %v661_v20  ;;  %v75_v30 = vcvt.s32.f32 %v662_v21  ;;  %v285_v32 = vld [vmem:[%s1012_s2 + $0x28] sm:$0xff]  ;;  %v78_v34 = vcvt.s32.f32 %v669_v23  ;;  %v79_v35 = vcvt.s32.f32 %v670_v24  ;;  %v292_v43 = vld [vmem:[%s1012_s2 + $0x60] sm:$0xff]  ;;  %v295_v58 = vld [vmem:[%s1012_s2 + $0x78] sm:$0xff] }
   0x9   :  { %v82_v36 = vcvt.s32.f32 %v677_v25  ;;  %v83_v37 = vcvt.s32.f32 %v678_v26  ;;  %v86_v39 = vpack.c.bf16 %v71_v28, %v70_v27  ;;  %v288_v44 = vld [vmem:[%s1012_s2 + $0x40] sm:$0xff]  ;;  %v293_v45 = vld [vmem:[%s1012_s2 + $0x68] sm:$0xff]  ;;  %v665_v48 = vunpack.c.2.s8 %v788_v13  ;;  %v291_v59 = vld [vmem:[%s1012_s2 + $0x58] sm:$0xff] }
   0xa   :  { %181 = vmatpush.bf16.msra.mxu0 %v648_v5  ;;  %v88_v40 = vpack.c.bf16 %v75_v30, %v74_v29  ;;  %v90_v41 = vpack.c.bf16 %v79_v35, %v78_v34  ;;  %v666_v49 = vunpack.c.3.s8 %v788_v13  ;;  %v673_v50 = vunpack.c.2.s8 %v796_v15  ;;  %v294_v4 = vld [vmem:[%s1012_s2 + $0x70] sm:$0xff] }
   0xb   :  { %689 = vmatpush.bf16.msra.mxu1 %v648_v5  ;;  %690 = vmatpush.bf16.msra.mxu2 %v648_v5  ;;  %v92_v42 = vpack.c.bf16 %v83_v37, %v82_v36  ;;  %v674_v51 = vunpack.c.3.s8 %v796_v15  ;;  %v681_v52 = vunpack.c.2.s8 %v801_v16  ;;  %v682_v53 = vunpack.c.3.s8 %v801_v16 }
   0xc   :  { %691 = vmatpush.bf16.msra.mxu3 %v648_v5  ;;  %303 = vperm.xlu0 %716, %v281_v6   ;;  %v72_v54 = vcvt.s32.f32 %v657_v46  ;;  %v73_v55 = vcvt.s32.f32 %v658_v47  ;;  %v76_v56 = vcvt.s32.f32 %v665_v48  ;;  %v77_v57 = vcvt.s32.f32 %v666_v49 }
   0xd   :  { %313 = vperm.xlu1 %717, %v283_v8   ;;  %v80_v60 = vcvt.s32.f32 %v673_v50  ;;  %v81_v61 = vcvt.s32.f32 %v674_v51  ;;  %v84_v62 = vcvt.s32.f32 %v681_v52  ;;  %v85_v63 = vcvt.s32.f32 %v682_v53 }
   0xe   :  { %182 = vmatpush.bf16.msra.mxu0 %v647_v7  ;;  %v87_v0 = vpack.c.bf16 %v73_v55, %v72_v54  ;;  %v89_v1 = vpack.c.bf16 %v77_v57, %v76_v56  ;;  %v721_v5 = vmov 0.0  }
   0xf   :  { %692 = vmatpush.bf16.msra.mxu1 %v647_v7  ;;  %693 = vmatpush.bf16.msra.mxu2 %v647_v7  ;;  %v91_v2 = vpack.c.bf16 %v81_v61, %v80_v60  ;;  %v93_v3 = vpack.c.bf16 %v85_v63, %v84_v62  ;;  %22 = vst.msk [vmem:[#allocation2] sm:$0xff] %vm21_vm0, %v721_v5 }
  0x10   :  { %694 = vmatpush.bf16.msra.mxu3 %v647_v7  ;;  %323 = vperm.xlu2 %718, %v285_v32   ;;  %23 = vst.msk [vmem:[#allocation2 + $0x8] sm:$0xff] %vm21_vm0, %v721_v5 }
  0x11   :  { %24 = vst.msk [vmem:[#allocation2 + $0x10] sm:$0xff] %vm21_vm0, %v721_v5 }
  0x12   :  { %183 = vmatpush.bf16.msra.mxu0 %v646_v9  ;;  %25 = vst.msk [vmem:[#allocation2 + $0x18] sm:$0xff] %vm21_vm0, %v721_v5 }
  0x13   :  { %695 = vmatpush.bf16.msra.mxu1 %v646_v9  ;;  %696 = vmatpush.bf16.msra.mxu2 %v646_v9  ;;  %26 = vst.msk [vmem:[#allocation2 + $0x20] sm:$0xff] %vm21_vm0, %v721_v5 }
  0x14   :  { %697 = vmatpush.bf16.msra.mxu3 %v646_v9  ;;  %328 = vperm.xlu0 %716, %v286_v11   ;;  %27 = vst.msk [vmem:[#allocation2 + $0x28] sm:$0xff] %vm21_vm0, %v721_v5 }
  0x15   :  { %333 = vperm.xlu1 %717, %v287_v14   ;;  %28 = vst.msk [vmem:[#allocation2 + $0x30] sm:$0xff] %vm21_vm0, %v721_v5 }
  0x16   :  { %184 = vmatpush.bf16.msra.mxu0 %v645_v10  ;;  %29 = vst.msk [vmem:[#allocation2 + $0x38] sm:$0xff] %vm21_vm0, %v721_v5  ;;  %v115_v12 = vld [vmem:[#allocation2] sm:$0xff] }
  0x17   :  { %698 = vmatpush.bf16.msra.mxu1 %v645_v10  ;;  %699 = vmatpush.bf16.msra.mxu2 %v645_v10  ;;  %30 = vst.msk [vmem:[#allocation2 + $0x40] sm:$0xff] %vm21_vm0, %v721_v5  ;;  %v116_v23 = vld [vmem:[#allocation2 + $0x8] sm:$0xff] }
  0x18   :  { %700 = vmatpush.bf16.msra.mxu3 %v645_v10  ;;  %338 = vperm.xlu2 %718, %v288_v44   ;;  %31 = vst.msk [vmem:[#allocation2 + $0x48] sm:$0xff] %vm21_vm0, %v721_v5 }
  0x19   :  { %32 = vst.msk [vmem:[#allocation2 + $0x50] sm:$0xff] %vm21_vm0, %v721_v5 }
  0x1a   :  { %185 = vmatpush.bf16.msra.mxu0 %v644_v22  ;;  %33 = vst.msk [vmem:[#allocation2 + $0x58] sm:$0xff] %vm21_vm0, %v721_v5  ;;  %v119_v13 = vld [vmem:[#allocation2 + $0x20] sm:$0xff] }
  0x1b   :  { %701 = vmatpush.bf16.msra.mxu1 %v644_v22  ;;  %702 = vmatpush.bf16.msra.mxu2 %v644_v22  ;;  %34 = vst.msk [vmem:[#allocation2 + $0x60] sm:$0xff] %vm21_vm0, %v721_v5  ;;  %v120_v24 = vld [vmem:[#allocation2 + $0x28] sm:$0xff] }
  0x1c   :  { %703 = vmatpush.bf16.msra.mxu3 %v644_v22  ;;  %343 = vperm.xlu0 %716, %v289_v31   ;;  %35 = vst.msk [vmem:[#allocation2 + $0x68] sm:$0xff] %vm21_vm0, %v721_v5  ;;  %v904_v31 = vld [vmem:[%s1013_s3] ss:$0 sm:$0xff]  ;;  %v121_v49 = vld [vmem:[#allocation2 + $0x30] sm:$0xff] }
  0x1d   :  { %348 = vperm.xlu1 %717, %v290_v38   ;;  %36 = vst.msk [vmem:[#allocation2 + $0x70] sm:$0xff] %vm21_vm0, %v721_v5 }
  0x1e   :  { %186 = vmatpush.bf16.msra.mxu0 %v643_v33  ;;  %37 = vst.msk [vmem:[#allocation2 + $0x78] sm:$0xff] %vm21_vm0, %v721_v5  ;;  %v123_v19 = vld [vmem:[#allocation2 + $0x40] sm:$0xff] }
  0x1f   :  { %704 = vmatpush.bf16.msra.mxu1 %v643_v33  ;;  %705 = vmatpush.bf16.msra.mxu2 %v643_v33 }
  0x20   :  { %706 = vmatpush.bf16.msra.mxu3 %v643_v33  ;;  %353 = vperm.xlu2 %718, %v291_v59  }
  0x21   :  { %187 = vmatmul.bf16.vlgmr.msra.gmra.mxu0 %v86_v39  ;;  %v124_v39 = vld [vmem:[#allocation2 + $0x48] sm:$0xff] }
  0x22   :  { %197 = vmatmul.bf16.vlgmr.msra.gmra.mxu1 %v88_v40  ;;  %207 = vmatmul.bf16.vlgmr.msra.gmra.mxu2 %v90_v41  ;;  %v127_v20 = vld [vmem:[#allocation2 + $0x60] sm:$0xff] }
  0x23   :  { %217 = vmatmul.bf16.vlgmr.msra.gmra.mxu3 %v92_v42  ;;  %v128_v41 = vld [vmem:[#allocation2 + $0x68] sm:$0xff] }
  0x24   :  { %358 = vperm.xlu0 %716, %v292_v43  }
  0x25   :  { %363 = vperm.xlu1 %717, %v293_v45   ;;  %v117_v45 = vld [vmem:[#allocation2 + $0x10] sm:$0xff] }
  0x28   :  { %368 = vperm.xlu2 %718, %v294_v4  }
  0x2c   :  { %373 = vperm.xlu0 %716, %v295_v58  }
  0x31   :  { %192 = vmatmul.bf16.gmra.mxu0 %v87_v0 }
  0x32   :  { %202 = vmatmul.bf16.gmra.mxu1 %v89_v1  ;;  %212 = vmatmul.bf16.gmra.mxu2 %v91_v2 }
  0x33   :  { %222 = vmatmul.bf16.gmra.mxu3 %v93_v3 }
  0x62   :  { %v319_v9 = vpop.permute.xlu2 %318 }
  0x6a   :  { %v324_v18 = vpop.permute.xlu2 %323 }
  0x72   :  { %v339_v51 = vpop.permute.xlu2 %338 }
  0x76   :  { %v299_v6 = vpop.permute.xlu0 %298 }
  0x77   :  { %v889_v8 = vpop.permute.xlu1 %308 }
  0x7e   :  { %v887_v7 = vpop.permute.xlu0 %303 }
  0x7f   :  { %v893_v11 = vpop.permute.xlu1 %313 }
  0x86   :  { %v891_v10 = vpop.permute.xlu0 %328 }
  0x87   :  { %v899_v22 = vpop.permute.xlu1 %333 }
  0x8e   :  { %v897_v21 = vpop.permute.xlu0 %343 }
  0x8f   :  { %v914_v57 = vpop.permute.xlu1 %348 }
  0x96   :  { %v359_v54 = vpop.permute.xlu0 %358 }
  0x9e   :  { %v188_v14 = vpop.f32.mrf.mxu0 }
  0x9f   :  { %v198_v15 = vpop.f32.mrf.mxu1  ;;  %v228_v16 = vadd.f32 %v188_v14, %v115_v12 }
  0xa0   :  { %v232_v17 = vadd.f32 %v198_v15, %v119_v13  ;;  %v125_v13 = vld [vmem:[#allocation2 + $0x50] sm:$0xff] }
  0xa1   :  { %245 = vst.msk [vmem:[#allocation2] sm:$0xff] %vm21_vm0, %v228_v16  ;;  %v129_v16 = vld [vmem:[#allocation2 + $0x70] sm:$0xff] }
  0xa2   :  { %249 = vst.msk [vmem:[#allocation2 + $0x20] sm:$0xff] %vm21_vm0, %v232_v17 }
  0xa5   :  { %v208_v25 = vpop.f32.mrf.mxu2 }
  0xa6   :  { %v218_v26 = vpop.f32.mrf.mxu3  ;;  %v236_v27 = vadd.f32 %v208_v25, %v123_v19  ;;  %v190_v29 = vpop.f32.mrf.mxu0 }
  0xa7   :  { %v240_v28 = vadd.f32 %v218_v26, %v127_v20  ;;  %v200_v30 = vpop.f32.mrf.mxu1  ;;  %v229_v32 = vadd.f32 %v190_v29, %v116_v23  ;;  %v364_v20 = vpop.permute.xlu1 %363 }
  0xa8   :  { %v233_v33 = vadd.f32 %v200_v30, %v120_v24  ;;  %v264_v34 = vld [vmem:[#allocation2] sm:$0xff]  ;;  %253 = vst.msk [vmem:[#allocation2 + $0x40] sm:$0xff] %vm21_vm0, %v236_v27  ;;  %v354_v29 = vpop.permute.xlu2 %353 }
  0xa9   :  { %v376_v35 = vmul.f32 %v299_v6, %v264_v34  ;;  %v268_v36 = vld [vmem:[#allocation2 + $0x20] sm:$0xff]  ;;  %257 = vst.msk [vmem:[#allocation2 + $0x60] sm:$0xff] %vm21_vm0, %v240_v28 }
  0xaa   :  { %v380_v37 = vmul.f32 %v319_v9, %v268_v36  ;;  %246 = vst.msk [vmem:[#allocation2 + $0x8] sm:$0xff] %vm21_vm0, %v229_v32 }
  0xab   :  { %v396_v38 = vadd.f32 %v904_v31, %v376_v35  ;;  %250 = vst.msk [vmem:[#allocation2 + $0x28] sm:$0xff] %vm21_vm0, %v233_v33 }
  0xac   :  { %v400_v40 = vadd.f32 %v904_v31, %v380_v37 }
  0xad   :  { %v412_v42 = vmax.f32 %v396_v38, 0.0  ;;  %v210_v43 = vpop.f32.mrf.mxu2 }
  0xae   :  { %v220_v44 = vpop.f32.mrf.mxu3  ;;  %v416_v46 = vmax.f32 %v400_v40, 0.0  ;;  %v237_v47 = vadd.f32 %v210_v43, %v124_v39  ;;  %v193_v48 = vpop.f32.mrf.mxu0  ;;  %v126_v43 = vld [vmem:[#allocation2 + $0x58] sm:$0xff] }
  0xaf   :  { %v203_v50 = vpop.f32.mrf.mxu1  ;;  %428 = vst.msk [vmem:[#allocation2] sm:$0xff] %vm21_vm0, %v412_v42  ;;  %v272_v52 = vld [vmem:[#allocation2 + $0x40] sm:$0xff]  ;;  %v241_v53 = vadd.f32 %v220_v44, %v128_v41  ;;  %v230_v58 = vadd.f32 %v193_v48, %v117_v45  ;;  %v122_v41 = vld [vmem:[#allocation2 + $0x38] sm:$0xff] }
  0xb0   :  { %432 = vst.msk [vmem:[#allocation2 + $0x20] sm:$0xff] %vm21_vm0, %v416_v46  ;;  %v276_v55 = vld [vmem:[#allocation2 + $0x60] sm:$0xff]  ;;  %v384_v56 = vmul.f32 %v339_v51, %v272_v52  ;;  %v234_v61 = vadd.f32 %v203_v50, %v121_v49  ;;  %v369_v48 = vpop.permute.xlu2 %368 }
  0xb1   :  { %535 = vst.msk [vmem:[#allocation2 + $0x20] sm:$0xff] %vm21_vm0, %v721_v5  ;;  %v388_v59 = vmul.f32 %v359_v54, %v276_v55  ;;  %v265_v60 = vld [vmem:[#allocation2 + $0x8] sm:$0xff]  ;;  %v130_v55 = vld [vmem:[#allocation2 + $0x78] sm:$0xff] }
  0xb2   :  { %v404_v62 = vadd.f32 %v904_v31, %v384_v56  ;;  %v377_v63 = vmul.f32 %v887_v7, %v265_v60  ;;  %v269_v0 = vld [vmem:[#allocation2 + $0x28] sm:$0xff]  ;;  %254 = vst.msk [vmem:[#allocation2 + $0x48] sm:$0xff] %vm21_vm0, %v237_v47 }
  0xb3   :  { %v408_v1 = vadd.f32 %v904_v31, %v388_v59  ;;  %v381_v2 = vmul.f32 %v324_v18, %v269_v0  ;;  %258 = vst.msk [vmem:[#allocation2 + $0x68] sm:$0xff] %vm21_vm0, %v241_v53 }
  0xb4   :  { %v420_v3 = vmax.f32 %v404_v62, 0.0  ;;  %v397_v4 = vadd.f32 %v904_v31, %v377_v63  ;;  %247 = vst.msk [vmem:[#allocation2 + $0x10] sm:$0xff] %vm21_vm0, %v230_v58 }
  0xb5   :  { %v424_v6 = vmax.f32 %v408_v1, 0.0  ;;  %v401_v9 = vadd.f32 %v904_v31, %v381_v2  ;;  %251 = vst.msk [vmem:[#allocation2 + $0x30] sm:$0xff] %vm21_vm0, %v234_v61  ;;  %v213_v14 = vpop.f32.mrf.mxu2 }
  0xb6   :  { %v499_v12 = vld [vmem:[#allocation2] sm:$0xff]  ;;  %436 = vst.msk [vmem:[#allocation2 + $0x40] sm:$0xff] %vm21_vm0, %v420_v3  ;;  %v413_v7 = vmax.f32 %v397_v4, 0.0  ;;  %v223_v17 = vpop.f32.mrf.mxu3  ;;  %v238_v24 = vadd.f32 %v213_v14, %v125_v13  ;;  %v195_v39 = vpop.f32.mrf.mxu0 }
  0xb7   :  { %531 = vst.msk [vmem:[#allocation2] sm:$0xff] %vm21_vm0, %v499_v12  ;;  %v417_v15 = vmax.f32 %v401_v9, 0.0  ;;  %v242_v27 = vadd.f32 %v223_v17, %v129_v16  ;;  %v205_v42 = vpop.f32.mrf.mxu1  ;;  %v374_v13 = vpop.permute.xlu0 %373 }
  0xb8   :  { %440 = vst.msk [vmem:[#allocation2 + $0x60] sm:$0xff] %vm21_vm0, %v424_v6  ;;  %v235_v50 = vadd.f32 %v205_v42, %v122_v41 }
  0xb9   :  { %543 = vst.msk [vmem:[#allocation2 + $0x60] sm:$0xff] %vm21_vm0, %v721_v5  ;;  %v273_v18 = vld [vmem:[#allocation2 + $0x48] sm:$0xff] }
  0xba   :  { %539 = vst.msk [vmem:[#allocation2 + $0x40] sm:$0xff] %vm21_vm0, %v721_v5  ;;  %v385_v19 = vmul.f32 %v897_v21, %v273_v18  ;;  %v277_v23 = vld [vmem:[#allocation2 + $0x68] sm:$0xff] }
  0xbb   :  { %429 = vst.msk [vmem:[#allocation2 + $0x8] sm:$0xff] %vm21_vm0, %v413_v7  ;;  %v266_v25 = vld [vmem:[#allocation2 + $0x10] sm:$0xff]  ;;  %v389_v26 = vmul.f32 %v364_v20, %v277_v23 }
  0xbc   :  { %433 = vst.msk [vmem:[#allocation2 + $0x28] sm:$0xff] %vm21_vm0, %v417_v15  ;;  %v405_v28 = vadd.f32 %v904_v31, %v385_v19  ;;  %v378_v30 = vmul.f32 %v889_v8, %v266_v25  ;;  %v270_v32 = vld [vmem:[#allocation2 + $0x30] sm:$0xff] }
  0xbd   :  { %536 = vst.msk [vmem:[#allocation2 + $0x28] sm:$0xff] %vm21_vm0, %v721_v5  ;;  %v382_v21 = vmul.f32 %v891_v10, %v270_v32  ;;  %v409_v36 = vadd.f32 %v904_v31, %v389_v26  ;;  %v118_v10 = vld [vmem:[#allocation2 + $0x18] sm:$0xff]  ;;  %v215_v44 = vpop.f32.mrf.mxu2 }
  0xbe   :  { %v421_v33 = vmax.f32 %v405_v28, 0.0  ;;  %v398_v34 = vadd.f32 %v904_v31, %v378_v30  ;;  %255 = vst.msk [vmem:[#allocation2 + $0x50] sm:$0xff] %vm21_vm0, %v238_v24  ;;  %v231_v46 = vadd.f32 %v195_v39, %v118_v10  ;;  %v239_v52 = vadd.f32 %v215_v44, %v126_v43  ;;  %v225_v56 = vpop.f32.mrf.mxu3  ;;  %v547_v7 = vld [vmem:[#allocation2] sm:$0xff] }
  0xbf   :  { %v402_v35 = vadd.f32 %v904_v31, %v382_v21  ;;  %259 = vst.msk [vmem:[#allocation2 + $0x70] sm:$0xff] %vm21_vm0, %v242_v27  ;;  %v425_v40 = vmax.f32 %v409_v36, 0.0  ;;  %v243_v59 = vadd.f32 %v225_v56, %v130_v55  ;;  %v563_v17 = vsel %vm21_vm0, %v547_v7, 0.0  ;;  %v551_v24 = vld [vmem:[#allocation2 + $0x20] sm:$0xff] }
  0xc0   :  { %437 = vst.msk [vmem:[#allocation2 + $0x48] sm:$0xff] %vm21_vm0, %v421_v33  ;;  %v414_v8 = vmax.f32 %v398_v34, 0.0  ;;  %v559_v44 = vld [vmem:[#allocation2 + $0x60] sm:$0xff] }
  0xc1   :  { %540 = vst.msk [vmem:[#allocation2 + $0x48] sm:$0xff] %vm21_vm0, %v721_v5  ;;  %v418_v37 = vmax.f32 %v402_v35, 0.0  ;;  %v555_v35 = vld [vmem:[#allocation2 + $0x40] sm:$0xff] }
  0xc2   :  { %v500_v38 = vld [vmem:[#allocation2 + $0x8] sm:$0xff]  ;;  %430 = vst.msk [vmem:[#allocation2 + $0x10] sm:$0xff] %vm21_vm0, %v414_v8 }
  0xc3   :  { %532 = vst.msk [vmem:[#allocation2 + $0x8] sm:$0xff] %vm21_vm0, %v500_v38 }
  0xc4   :  { %533 = vst.msk [vmem:[#allocation2 + $0x10] sm:$0xff] %vm21_vm0, %v721_v5  ;;  %v552_v25 = vld [vmem:[#allocation2 + $0x28] sm:$0xff] }
  0xc5   :  { %434 = vst.msk [vmem:[#allocation2 + $0x30] sm:$0xff] %vm21_vm0, %v418_v37  ;;  %v274_v45 = vld [vmem:[#allocation2 + $0x50] sm:$0xff]  ;;  %v572_v32 = vsel %vm21_vm0, %v552_v25, 0.0 }
  0xc6   :  { %537 = vst.msk [vmem:[#allocation2 + $0x30] sm:$0xff] %vm21_vm0, %v721_v5  ;;  %v386_v47 = vmul.f32 %v914_v57, %v274_v45  ;;  %v278_v49 = vld [vmem:[#allocation2 + $0x70] sm:$0xff] }
  0xc7   :  { %441 = vst.msk [vmem:[#allocation2 + $0x68] sm:$0xff] %vm21_vm0, %v425_v40  ;;  %v390_v51 = vmul.f32 %v369_v48, %v278_v49  ;;  %v586_v49 = vsel %vm21_vm0, %v559_v44, 0.0 }
  0xc8   :  { %544 = vst.msk [vmem:[#allocation2 + $0x68] sm:$0xff] %vm21_vm0, %v721_v5  ;;  %v406_v53 = vadd.f32 %v904_v31, %v386_v47  ;;  %v556_v37 = vld [vmem:[#allocation2 + $0x48] sm:$0xff] }
  0xc9   :  { %v410_v54 = vadd.f32 %v904_v31, %v390_v51  ;;  %248 = vst.msk [vmem:[#allocation2 + $0x18] sm:$0xff] %vm21_vm0, %v231_v46  ;;  %v580_v40 = vsel %vm21_vm0, %v556_v37, 0.0 }
  0xca   :  { %v422_v58 = vmax.f32 %v406_v53, 0.0  ;;  %252 = vst.msk [vmem:[#allocation2 + $0x38] sm:$0xff] %vm21_vm0, %v235_v50  ;;  %v548_v4 = vld [vmem:[#allocation2 + $0x8] sm:$0xff] }
  0xcb   :  { %v426_v57 = vmax.f32 %v410_v54, 0.0  ;;  %256 = vst.msk [vmem:[#allocation2 + $0x58] sm:$0xff] %vm21_vm0, %v239_v52  ;;  %v564_v15 = vsel %vm21_vm0, %v548_v4, 0.0  ;;  %v549_v16 = vld [vmem:[#allocation2 + $0x10] sm:$0xff] }
  0xcc   :  { %438 = vst.msk [vmem:[#allocation2 + $0x50] sm:$0xff] %vm21_vm0, %v422_v58  ;;  %v565_v19 = vadd.f32 %v564_v15, %v563_v17  ;;  %v566_v20 = vsel %vm21_vm0, %v549_v16, 0.0 }
  0xcd   :  { %541 = vst.msk [vmem:[#allocation2 + $0x50] sm:$0xff] %vm21_vm0, %v721_v5 }
  0xce   :  { %442 = vst.msk [vmem:[#allocation2 + $0x70] sm:$0xff] %vm21_vm0, %v426_v57  ;;  %v567_v26 = vadd.f32 %v566_v20, %v565_v19 }
  0xcf   :  { %545 = vst.msk [vmem:[#allocation2 + $0x70] sm:$0xff] %vm21_vm0, %v721_v5  ;;  %v560_v47 = vld [vmem:[#allocation2 + $0x68] sm:$0xff] }
  0xd0   :  { %v267_v60 = vld [vmem:[#allocation2 + $0x18] sm:$0xff]  ;;  %260 = vst.msk [vmem:[#allocation2 + $0x78] sm:$0xff] %vm21_vm0, %v243_v59  ;;  %v588_v52 = vsel %vm21_vm0, %v560_v47, 0.0 }
  0xd1   :  { %v379_v61 = vmul.f32 %v893_v11, %v267_v60  ;;  %v271_v62 = vld [vmem:[#allocation2 + $0x38] sm:$0xff] }
  0xd2   :  { %v383_v63 = vmul.f32 %v899_v22, %v271_v62  ;;  %v275_v0 = vld [vmem:[#allocation2 + $0x58] sm:$0xff] }
  0xd3   :  { %v399_v1 = vadd.f32 %v904_v31, %v379_v61  ;;  %v387_v2 = vmul.f32 %v354_v29, %v275_v0  ;;  %v553_v29 = vld [vmem:[#allocation2 + $0x30] sm:$0xff]  ;;  %v600_v61 = vlaneseq }
  0xd4   :  { %v403_v3 = vadd.f32 %v904_v31, %v383_v63  ;;  %v574_v34 = vsel %vm21_vm0, %v553_v29, 0.0  ;;  %v557_v10 = vld [vmem:[#allocation2 + $0x50] sm:$0xff] }
  0xd5   :  { %v415_v6 = vmax.f32 %v399_v1, 0.0  ;;  %v407_v9 = vadd.f32 %v904_v31, %v387_v2  ;;  %v582_v43 = vsel %vm21_vm0, %v557_v10, 0.0  ;;  %v601_v0 = vshrl.u32 %v600_v61, 7 }
  0xd6   :  { %v419_v12 = vmax.f32 %v403_v3, 0.0  ;;  %v561_v50 = vld [vmem:[#allocation2 + $0x70] sm:$0xff] }
  0xd7   :  { %431 = vst.msk [vmem:[#allocation2 + $0x18] sm:$0xff] %vm21_vm0, %v415_v6  ;;  %v423_v14 = vmax.f32 %v407_v9, 0.0  ;;  %v279_v11 = vld [vmem:[#allocation2 + $0x78] sm:$0xff]  ;;  %v590_v55 = vsel %vm21_vm0, %v561_v50, 0.0  ;;  %vm602_vm1 = vcmp.eq.s32.totalorder %v601_v0, 0 }
  0xd8   :  { %534 = vst.msk [vmem:[#allocation2 + $0x18] sm:$0xff] %vm21_vm0, %v721_v5  ;;  %v391_v22 = vmul.f32 %v374_v13, %v279_v11 }
  0xd9   :  { %435 = vst.msk [vmem:[#allocation2 + $0x38] sm:$0xff] %vm21_vm0, %v419_v12 }
  0xda   :  { %538 = vst.msk [vmem:[#allocation2 + $0x38] sm:$0xff] %vm21_vm0, %v721_v5  ;;  %v411_v18 = vadd.f32 %v904_v31, %v391_v22  ;;  %v570_v31 = vsel %vm21_vm0, %v551_v24, 0.0 }
  0xdb   :  { %439 = vst.msk [vmem:[#allocation2 + $0x58] sm:$0xff] %vm21_vm0, %v423_v14 }
  0xdc   :  { %542 = vst.msk [vmem:[#allocation2 + $0x58] sm:$0xff] %vm21_vm0, %v721_v5  ;;  %v427_v23 = vmax.f32 %v411_v18, 0.0 }
  0xde   :  { %443 = vst.msk [vmem:[#allocation2 + $0x78] sm:$0xff] %vm21_vm0, %v427_v23 }
  0xdf   :  { %v550_v27 = vld [vmem:[#allocation2 + $0x18] sm:$0xff]  ;;  %546 = vst.msk [vmem:[#allocation2 + $0x78] sm:$0xff] %vm21_vm0, %v721_v5  ;;  %v578_v5 = vsel %vm21_vm0, %v555_v35, 0.0 }
  0xe0   :  { %v568_v28 = vsel %vm21_vm0, %v550_v27, 0.0 }
  0xe1   :  { %v569_v30 = vadd.f32 %v568_v28, %v567_v26  ;;  %v554_v33 = vld [vmem:[#allocation2 + $0x38] sm:$0xff] }
  0xe2   :  { %v576_v8 = vsel %vm21_vm0, %v554_v33, 0.0 }
  0xe3   :  { %v571_v21 = vadd.f32 %v570_v31, %v569_v30  ;;  %v558_v42 = vld [vmem:[#allocation2 + $0x58] sm:$0xff] }
  0xe4   :  { %v584_v46 = vsel %vm21_vm0, %v558_v42, 0.0 }
  0xe5   :  { %v573_v36 = vadd.f32 %v572_v32, %v571_v21 }
  0xe6   :  { %v562_v54 = vld [vmem:[#allocation2 + $0x78] sm:$0xff] }
  0xe7   :  { %v575_v38 = vadd.f32 %v574_v34, %v573_v36  ;;  %v592_v58 = vsel %vm21_vm0, %v562_v54, 0.0 }
  0xe9   :  { %v577_v39 = vadd.f32 %v576_v8, %v575_v38 }
  0xeb   :  { %v579_v41 = vadd.f32 %v578_v5, %v577_v39 }
  0xed   :  { %v581_v45 = vadd.f32 %v580_v40, %v579_v41 }
  0xef   :  { %v583_v48 = vadd.f32 %v582_v43, %v581_v45 }
  0xf1   :  { %v585_v51 = vadd.f32 %v584_v46, %v583_v48 }
  0xf3   :  { %v587_v53 = vadd.f32 %v586_v49, %v585_v51 }
  0xf5   :  { %v589_v56 = vadd.f32 %v588_v52, %v587_v53 }
  0xf7   :  { %v591_v57 = vadd.f32 %v590_v55, %v589_v56 }
  0xf9   :  { %v593_v59 = vadd.f32 %v592_v58, %v591_v57 }
  0xfb   :  { %v594_v60 = vrot.slane %v593_v59, 4 }
  0xfd   :  { %v595_v62 = vadd.f32 %v594_v60, %v593_v59 }
  0xff   :  { %v596_v63 = vrot.slane %v595_v62, 2 }
 0x101   :  { %v597_v1 = vadd.f32 %v596_v63, %v595_v62 }
 0x103   :  { %v598_v2 = vrot.slane %v597_v1, 1 }
 0x105   :  { %v599_v3 = vadd.f32 %v598_v2, %v597_v1 }
 0x107   :  { %v603_v4 = vsel %vm602_vm1, %v599_v3, 0.0 }
 0x108   :  { %604 = vst.msk [vmem:[%s1015_s4] sm:$0xff] %vm21_vm0, %v603_v4 }

</bundles_post_ra>
